<compile_context>
chip_gen: v6e
topology: v6e:2x2x1
jax: 0.10.0
libtpu: 0.0.40
codegen_flags: <defaults>
</compile_context>

<pallas_src>
import jax
import jax.numpy as jnp
from jax.experimental import pallas as pl
from jax.experimental.pallas import tpu as pltpu

K1, K2 = 4, 3   # conv kernel sizes (c1, c2)
P1, P2 = 3, 2   # maxpool windows (p1, p2)


def _make_kernel(B, L, E, H, O_pad):
    """Build the kernel with static shape config baked in (closure)."""
    L1 = L - K1 + 1          # after conv1
    L2 = L1 // P1            # after pool1
    L3 = L2 - K2 + 1         # after conv2
    L4 = L3 // P2            # after pool2

    def kernel(x_ref, w1_ref, b1_ref, w2_ref, b2_ref, wo_ref, bo_ref,
               out_ref, p1_ref):
        # x_ref : [L*B, E]  time-major slab (row = t*B + b), float32
        # w1_ref: [K1, E, H] tap-major conv1 weights (W_torch[:, :, k].T)
        # b1_ref: [1, H]
        # w2_ref: [K2, H, H]
        # b2_ref: [1, H]
        # wo_ref: [H, O_pad]  (zero-padded to 128 lanes)
        # bo_ref: [1, O_pad]
        # out_ref: [B, L4, O_pad]
        # p1_ref : VMEM scratch [L2*B, H] (pool-1 output, time-major)

        # ---- c1: Conv1d(E -> H, k=4) as K1 time-batched matmuls -------------
        c1 = jnp.dot(x_ref[0:L1 * B, :], w1_ref[0],
                     preferred_element_type=jnp.float32)
        for k in range(1, K1):
            c1 = c1 + jnp.dot(x_ref[k * B:(k + L1) * B, :], w1_ref[k],
                              preferred_element_type=jnp.float32)
        c1 = c1 + b1_ref[...]                      # [L1*B, H], bias added once

        # ---- p1: MaxPool1d(3) over time; staged into VMEM scratch -----------
        for j in range(L2):
            m = c1[(P1 * j) * B:(P1 * j + 1) * B, :]
            for r in range(1, P1):
                m = jnp.maximum(
                    m, c1[(P1 * j + r) * B:(P1 * j + r + 1) * B, :])
            p1_ref[j * B:(j + 1) * B, :] = m       # [B, H] block, time-major

        # ---- c2: Conv1d(H -> H, k=3) as K2 time-batched matmuls -------------
        c2 = jnp.dot(p1_ref[0:L3 * B, :], w2_ref[0],
                     preferred_element_type=jnp.float32)
        for k in range(1, K2):
            c2 = c2 + jnp.dot(p1_ref[k * B:(k + L3) * B, :], w2_ref[k],
                              preferred_element_type=jnp.float32)
        c2 = c2 + b2_ref[...]                      # [L3*B, H]

        # ---- p2: MaxPool1d(2) + Linear(H -> O_pad), lane-dense stores -------
        wo = wo_ref[...]
        bo = bo_ref[...]
        for j in range(L4):                        # L4 == 1 for this module
            m = c2[(P2 * j) * B:(P2 * j + 1) * B, :]
            for r in range(1, P2):
                m = jnp.maximum(
                    m, c2[(P2 * j + r) * B:(P2 * j + r + 1) * B, :])
            out_ref[:, j, :] = jnp.dot(m, wo,
                                       preferred_element_type=jnp.float32) + bo

    return kernel


def cnn_encoder(x, params):
    """x: [B, L, E] float32.  Returns [B, O] when the pooled length is 1
    (matching the PyTorch module's .squeeze()), else [B, L4, O]."""
    w1, b1, w2, b2, wo, bo = params
    B, L, E = x.shape
    H = w1.shape[2]
    O = wo.shape[1]
    L1 = L - K1 + 1
    L2 = L1 // P1
    L3 = L2 - K2 + 1
    L4 = L3 // P2
    assert L4 >= 1, "sequence too short for this encoder"

    # Pad the Linear output to a multiple of 128 lanes so the final store is a
    # full-width (unmasked) vst; padding columns are zero and sliced off below.
    O_pad = ((O + 127) // 128) * 128
    wo_pad = jnp.pad(wo, ((0, 0), (0, O_pad - O)))
    bo_pad = jnp.pad(bo, ((0, 0), (0, O_pad - O)))

    # Time-major 2-D slab (row = t*B + b): layout plumbing done in XLA so the
    # kernel only does contiguous sublane slices + matmuls.
    x2 = jnp.transpose(x, (1, 0, 2)).reshape(L * B, E)

    flops = 2 * (L1 * B * K1 * E * H            # conv1
                 + L3 * B * K2 * H * H          # conv2
                 + L4 * B * H * O_pad)          # linear
    bytes_accessed = 4 * (x2.size + w1.size + b1.size + w2.size + b2.size
                          + wo_pad.size + bo_pad.size + B * L4 * O_pad)

    out = pl.pallas_call(
        _make_kernel(B, L, E, H, O_pad),
        out_shape=jax.ShapeDtypeStruct((B, L4, O_pad), jnp.float32),
        in_specs=[pl.BlockSpec(memory_space=pltpu.MemorySpace.VMEM)] * 7,
        out_specs=pl.BlockSpec(memory_space=pltpu.MemorySpace.VMEM),
        scratch_shapes=[pltpu.VMEM((L2 * B, H), jnp.float32)],
        cost_estimate=pl.CostEstimate(flops=flops, transcendentals=0,
                                      bytes_accessed=bytes_accessed),
    )(x2, w1, b1, w2, b2, wo_pad, bo_pad)

    out = out[:, :, :O]
    if L4 == 1:
        # PyTorch `.squeeze()` drops the size-1 pooled-length dim (assumes B>1).
        out = out[:, 0, :]
    return out


def reference(x, params):
    """Plain-JAX reference of the same forward pass (for verification)."""
    w1, b1, w2, b2, wo, bo = params
    B, L, E = x.shape
    H = w1.shape[2]
    c1 = jnp.stack(
        [sum(x[:, t + k, :] @ w1[k] for k in range(K1)) + b1
         for t in range(L - K1 + 1)], axis=1)
    L1 = c1.shape[1]
    L2 = L1 // P1
    p1 = c1[:, :L2 * P1, :].reshape(B, L2, P1, H).max(axis=2)
    c2 = jnp.stack(
        [sum(p1[:, t + k, :] @ w2[k] for k in range(K2)) + b2
         for t in range(L2 - K2 + 1)], axis=1)
    L3 = c2.shape[1]
    L4 = L3 // P2
    p2 = c2[:, :L4 * P2, :].reshape(B, L4, P2, H).max(axis=2)
    out = p2 @ wo + bo
    return out[:, 0, :] if L4 == 1 else out


if __name__ == "__main__":
    # Small shapes consistent with the module:
    #   batch=2, seq_len=16, embedding(input_size)=8, hidden=32, output=16.
    # seq_len=16 makes the final pooled length exactly 1 (as the module's
    # .squeeze() expects).
    B, L, E, H, O = 2, 16, 8, 32, 16

    key = jax.random.PRNGKey(0)
    ks = jax.random.split(key, 7)
    x = jax.random.normal(ks[0], (B, L, E), jnp.float32)

    # Deterministic synthetic parameters (tap-major conv weights, [in, out]).
    w1 = jax.random.normal(ks[1], (K1, E, H), jnp.float32) / jnp.sqrt(E * K1)
    b1 = jax.random.normal(ks[2], (1, H), jnp.float32) * 0.1
    w2 = jax.random.normal(ks[3], (K2, H, H), jnp.float32) / jnp.sqrt(H * K2)
    b2 = jax.random.normal(ks[4], (1, H), jnp.float32) * 0.1
    wo = jax.random.normal(ks[5], (H, O), jnp.float32) / jnp.sqrt(H)
    bo = jax.random.normal(ks[6], (1, O), jnp.float32) * 0.1
    params = (w1, b1, w2, b2, wo, bo)

    out = jax.block_until_ready(cnn_encoder(x, params))
    ref = reference(x, params)

    assert out.shape == (B, O), out.shape
    assert jnp.allclose(out, ref, atol=1e-4, rtol=1e-4), \
        float(jnp.max(jnp.abs(out - ref)))
    print("KERNEL_OK")
</pallas_src>

<mosaic_0001>
module attributes {stable_mosaic.version = 11 : i64} {
  func.func @kernel(%arg0: memref<32x8xf32, #tpu.memory_space<vmem>>, %arg1: memref<4x8x32xf32, #tpu.memory_space<vmem>>, %arg2: memref<1x32xf32, #tpu.memory_space<vmem>>, %arg3: memref<3x32x32xf32, #tpu.memory_space<vmem>>, %arg4: memref<1x32xf32, #tpu.memory_space<vmem>>, %arg5: memref<32x128xf32, #tpu.memory_space<vmem>>, %arg6: memref<1x128xf32, #tpu.memory_space<vmem>>, %arg7: memref<2x1x128xf32, #tpu.memory_space<vmem>>, %arg8: memref<8x32xf32, #tpu.memory_space<vmem>>) attributes {dimension_semantics = [], scalar_prefetch = 0 : i64, scratch_operands = 1 : i64, tpu.core_type = #tpu.core_type<tc>} {
    %c0 = arith.constant 0 : index
    %c0_0 = arith.constant 0 : index
    %0 = vector.load %arg0[%c0, %c0_0] : memref<32x8xf32, #tpu.memory_space<vmem>>, vector<26x8xf32>
    %c0_1 = arith.constant 0 : index
    %c0_2 = arith.constant 0 : index
    %c0_3 = arith.constant 0 : index
    %1 = vector.load %arg1[%c0_1, %c0_2, %c0_3] : memref<4x8x32xf32, #tpu.memory_space<vmem>>, vector<1x8x32xf32>
    %2 = vector.shape_cast %1 : vector<1x8x32xf32> to vector<8x32xf32>
    %cst = arith.constant dense<0.000000e+00> : vector<26x32xf32>
    %3 = tpu.matmul %0, %2, %cst {dimension_numbers = #tpu.dot_dimension_numbers<[1], [0], [0], [1], [0, 0, 1, 1], [], []>} : vector<26x8xf32>, vector<8x32xf32>, vector<26x32xf32> -> vector<26x32xf32>
    %c2 = arith.constant 2 : index
    %c0_4 = arith.constant 0 : index
    %4 = vector.load %arg0[%c2, %c0_4] : memref<32x8xf32, #tpu.memory_space<vmem>>, vector<26x8xf32>
    %c1 = arith.constant 1 : index
    %c0_5 = arith.constant 0 : index
    %c0_6 = arith.constant 0 : index
    %5 = vector.load %arg1[%c1, %c0_5, %c0_6] : memref<4x8x32xf32, #tpu.memory_space<vmem>>, vector<1x8x32xf32>
    %6 = vector.shape_cast %5 : vector<1x8x32xf32> to vector<8x32xf32>
    %cst_7 = arith.constant dense<0.000000e+00> : vector<26x32xf32>
    %7 = tpu.matmul %4, %6, %cst_7 {dimension_numbers = #tpu.dot_dimension_numbers<[1], [0], [0], [1], [0, 0, 1, 1], [], []>} : vector<26x8xf32>, vector<8x32xf32>, vector<26x32xf32> -> vector<26x32xf32>
    %8 = arith.addf %3, %7 : vector<26x32xf32>
    %c4 = arith.constant 4 : index
    %c0_8 = arith.constant 0 : index
    %9 = vector.load %arg0[%c4, %c0_8] : memref<32x8xf32, #tpu.memory_space<vmem>>, vector<26x8xf32>
    %c2_9 = arith.constant 2 : index
    %c0_10 = arith.constant 0 : index
    %c0_11 = arith.constant 0 : index
    %10 = vector.load %arg1[%c2_9, %c0_10, %c0_11] : memref<4x8x32xf32, #tpu.memory_space<vmem>>, vector<1x8x32xf32>
    %11 = vector.shape_cast %10 : vector<1x8x32xf32> to vector<8x32xf32>
    %cst_12 = arith.constant dense<0.000000e+00> : vector<26x32xf32>
    %12 = tpu.matmul %9, %11, %cst_12 {dimension_numbers = #tpu.dot_dimension_numbers<[1], [0], [0], [1], [0, 0, 1, 1], [], []>} : vector<26x8xf32>, vector<8x32xf32>, vector<26x32xf32> -> vector<26x32xf32>
    %13 = arith.addf %8, %12 : vector<26x32xf32>
    %c6 = arith.constant 6 : index
    %c0_13 = arith.constant 0 : index
    %14 = vector.load %arg0[%c6, %c0_13] : memref<32x8xf32, #tpu.memory_space<vmem>>, vector<26x8xf32>
    %c3 = arith.constant 3 : index
    %c0_14 = arith.constant 0 : index
    %c0_15 = arith.constant 0 : index
    %15 = vector.load %arg1[%c3, %c0_14, %c0_15] : memref<4x8x32xf32, #tpu.memory_space<vmem>>, vector<1x8x32xf32>
    %16 = vector.shape_cast %15 : vector<1x8x32xf32> to vector<8x32xf32>
    %cst_16 = arith.constant dense<0.000000e+00> : vector<26x32xf32>
    %17 = tpu.matmul %14, %16, %cst_16 {dimension_numbers = #tpu.dot_dimension_numbers<[1], [0], [0], [1], [0, 0, 1, 1], [], []>} : vector<26x8xf32>, vector<8x32xf32>, vector<26x32xf32> -> vector<26x32xf32>
    %18 = arith.addf %13, %17 : vector<26x32xf32>
    %c0_17 = arith.constant 0 : index
    %c0_18 = arith.constant 0 : index
    %19 = vector.load %arg2[%c0_17, %c0_18] : memref<1x32xf32, #tpu.memory_space<vmem>>, vector<1x32xf32>
    %20 = vector.broadcast %19 : vector<1x32xf32> to vector<26x32xf32>
    %21 = arith.addf %18, %20 : vector<26x32xf32>
    %22 = vector.extract_strided_slice %21 {offsets = [0, 0], sizes = [2, 32], strides = [1, 1]} : vector<26x32xf32> to vector<2x32xf32>
    %23 = vector.extract_strided_slice %21 {offsets = [2, 0], sizes = [2, 32], strides = [1, 1]} : vector<26x32xf32> to vector<2x32xf32>
    %24 = arith.maximumf %22, %23 : vector<2x32xf32>
    %25 = vector.extract_strided_slice %21 {offsets = [4, 0], sizes = [2, 32], strides = [1, 1]} : vector<26x32xf32> to vector<2x32xf32>
    %26 = arith.maximumf %24, %25 : vector<2x32xf32>
    %c0_19 = arith.constant 0 : index
    %c0_20 = arith.constant 0 : index
    %27 = vector.load %arg8[%c0_19, %c0_20] : memref<8x32xf32, #tpu.memory_space<vmem>>, vector<2x32xf32>
    tpu.vector_store %arg8[%c0_19, %c0_20], %26 {strides = array<i32>} : memref<8x32xf32, #tpu.memory_space<vmem>>, vector<2x32xf32>,
    %28 = vector.extract_strided_slice %21 {offsets = [6, 0], sizes = [2, 32], strides = [1, 1]} : vector<26x32xf32> to vector<2x32xf32>
    %29 = vector.extract_strided_slice %21 {offsets = [8, 0], sizes = [2, 32], strides = [1, 1]} : vector<26x32xf32> to vector<2x32xf32>
    %30 = arith.maximumf %28, %29 : vector<2x32xf32>
    %31 = vector.extract_strided_slice %21 {offsets = [10, 0], sizes = [2, 32], strides = [1, 1]} : vector<26x32xf32> to vector<2x32xf32>
    %32 = arith.maximumf %30, %31 : vector<2x32xf32>
    %c2_21 = arith.constant 2 : index
    %c0_22 = arith.constant 0 : index
    %33 = vector.load %arg8[%c2_21, %c0_22] : memref<8x32xf32, #tpu.memory_space<vmem>>, vector<2x32xf32>
    tpu.vector_store %arg8[%c2_21, %c0_22], %32 {strides = array<i32>} : memref<8x32xf32, #tpu.memory_space<vmem>>, vector<2x32xf32>,
    %34 = vector.extract_strided_slice %21 {offsets = [12, 0], sizes = [2, 32], strides = [1, 1]} : vector<26x32xf32> to vector<2x32xf32>
    %35 = vector.extract_strided_slice %21 {offsets = [14, 0], sizes = [2, 32], strides = [1, 1]} : vector<26x32xf32> to vector<2x32xf32>
    %36 = arith.maximumf %34, %35 : vector<2x32xf32>
    %37 = vector.extract_strided_slice %21 {offsets = [16, 0], sizes = [2, 32], strides = [1, 1]} : vector<26x32xf32> to vector<2x32xf32>
    %38 = arith.maximumf %36, %37 : vector<2x32xf32>
    %c4_23 = arith.constant 4 : index
    %c0_24 = arith.constant 0 : index
    %39 = vector.load %arg8[%c4_23, %c0_24] : memref<8x32xf32, #tpu.memory_space<vmem>>, vector<2x32xf32>
    tpu.vector_store %arg8[%c4_23, %c0_24], %38 {strides = array<i32>} : memref<8x32xf32, #tpu.memory_space<vmem>>, vector<2x32xf32>,
    %40 = vector.extract_strided_slice %21 {offsets = [18, 0], sizes = [2, 32], strides = [1, 1]} : vector<26x32xf32> to vector<2x32xf32>
    %41 = vector.extract_strided_slice %21 {offsets = [20, 0], sizes = [2, 32], strides = [1, 1]} : vector<26x32xf32> to vector<2x32xf32>
    %42 = arith.maximumf %40, %41 : vector<2x32xf32>
    %43 = vector.extract_strided_slice %21 {offsets = [22, 0], sizes = [2, 32], strides = [1, 1]} : vector<26x32xf32> to vector<2x32xf32>
    %44 = arith.maximumf %42, %43 : vector<2x32xf32>
    %c6_25 = arith.constant 6 : index
    %c0_26 = arith.constant 0 : index
    %45 = vector.load %arg8[%c6_25, %c0_26] : memref<8x32xf32, #tpu.memory_space<vmem>>, vector<2x32xf32>
    tpu.vector_store %arg8[%c6_25, %c0_26], %44 {strides = array<i32>} : memref<8x32xf32, #tpu.memory_space<vmem>>, vector<2x32xf32>,
    %c0_27 = arith.constant 0 : index
    %c0_28 = arith.constant 0 : index
    %46 = vector.load %arg8[%c0_27, %c0_28] : memref<8x32xf32, #tpu.memory_space<vmem>>, vector<4x32xf32>
    %c0_29 = arith.constant 0 : index
    %c0_30 = arith.constant 0 : index
    %c0_31 = arith.constant 0 : index
    %47 = vector.load %arg3[%c0_29, %c0_30, %c0_31] : memref<3x32x32xf32, #tpu.memory_space<vmem>>, vector<1x32x32xf32>
    %48 = vector.shape_cast %47 : vector<1x32x32xf32> to vector<32x32xf32>
    %cst_32 = arith.constant dense<0.000000e+00> : vector<4x32xf32>
    %49 = tpu.matmul %46, %48, %cst_32 {dimension_numbers = #tpu.dot_dimension_numbers<[1], [0], [0], [1], [0, 0, 1, 1], [], []>} : vector<4x32xf32>, vector<32x32xf32>, vector<4x32xf32> -> vector<4x32xf32>
    %c2_33 = arith.constant 2 : index
    %c0_34 = arith.constant 0 : index
    %50 = vector.load %arg8[%c2_33, %c0_34] : memref<8x32xf32, #tpu.memory_space<vmem>>, vector<4x32xf32>
    %c1_35 = arith.constant 1 : index
    %c0_36 = arith.constant 0 : index
    %c0_37 = arith.constant 0 : index
    %51 = vector.load %arg3[%c1_35, %c0_36, %c0_37] : memref<3x32x32xf32, #tpu.memory_space<vmem>>, vector<1x32x32xf32>
    %52 = vector.shape_cast %51 : vector<1x32x32xf32> to vector<32x32xf32>
    %cst_38 = arith.constant dense<0.000000e+00> : vector<4x32xf32>
    %53 = tpu.matmul %50, %52, %cst_38 {dimension_numbers = #tpu.dot_dimension_numbers<[1], [0], [0], [1], [0, 0, 1, 1], [], []>} : vector<4x32xf32>, vector<32x32xf32>, vector<4x32xf32> -> vector<4x32xf32>
    %54 = arith.addf %49, %53 : vector<4x32xf32>
    %c4_39 = arith.constant 4 : index
    %c0_40 = arith.constant 0 : index
    %55 = vector.load %arg8[%c4_39, %c0_40] : memref<8x32xf32, #tpu.memory_space<vmem>>, vector<4x32xf32>
    %c2_41 = arith.constant 2 : index
    %c0_42 = arith.constant 0 : index
    %c0_43 = arith.constant 0 : index
    %56 = vector.load %arg3[%c2_41, %c0_42, %c0_43] : memref<3x32x32xf32, #tpu.memory_space<vmem>>, vector<1x32x32xf32>
    %57 = vector.shape_cast %56 : vector<1x32x32xf32> to vector<32x32xf32>
    %cst_44 = arith.constant dense<0.000000e+00> : vector<4x32xf32>
    %58 = tpu.matmul %55, %57, %cst_44 {dimension_numbers = #tpu.dot_dimension_numbers<[1], [0], [0], [1], [0, 0, 1, 1], [], []>} : vector<4x32xf32>, vector<32x32xf32>, vector<4x32xf32> -> vector<4x32xf32>
    %59 = arith.addf %54, %58 : vector<4x32xf32>
    %c0_45 = arith.constant 0 : index
    %c0_46 = arith.constant 0 : index
    %60 = vector.load %arg4[%c0_45, %c0_46] : memref<1x32xf32, #tpu.memory_space<vmem>>, vector<1x32xf32>
    %61 = vector.broadcast %60 : vector<1x32xf32> to vector<4x32xf32>
    %62 = arith.addf %59, %61 : vector<4x32xf32>
    %c0_47 = arith.constant 0 : index
    %c0_48 = arith.constant 0 : index
    %63 = vector.load %arg5[%c0_47, %c0_48] : memref<32x128xf32, #tpu.memory_space<vmem>>, vector<32x128xf32>
    %c0_49 = arith.constant 0 : index
    %c0_50 = arith.constant 0 : index
    %64 = vector.load %arg6[%c0_49, %c0_50] : memref<1x128xf32, #tpu.memory_space<vmem>>, vector<1x128xf32>
    %65 = vector.extract_strided_slice %62 {offsets = [0, 0], sizes = [2, 32], strides = [1, 1]} : vector<4x32xf32> to vector<2x32xf32>
    %66 = vector.extract_strided_slice %62 {offsets = [2, 0], sizes = [2, 32], strides = [1, 1]} : vector<4x32xf32> to vector<2x32xf32>
    %67 = arith.maximumf %65, %66 : vector<2x32xf32>
    %cst_51 = arith.constant dense<0.000000e+00> : vector<2x128xf32>
    %68 = tpu.matmul %67, %63, %cst_51 {dimension_numbers = #tpu.dot_dimension_numbers<[1], [0], [0], [1], [0, 0, 1, 1], [], []>} : vector<2x32xf32>, vector<32x128xf32>, vector<2x128xf32> -> vector<2x128xf32>
    %69 = vector.broadcast %64 : vector<1x128xf32> to vector<2x128xf32>
    %70 = arith.addf %68, %69 : vector<2x128xf32>
    %c0_52 = arith.constant 0 : index
    %c0_53 = arith.constant 0 : index
    %c0_54 = arith.constant 0 : index
    %71 = vector.load %arg7[%c0_52, %c0_53, %c0_54] : memref<2x1x128xf32, #tpu.memory_space<vmem>>, vector<2x1x128xf32>
    %72 = vector.shape_cast %71 : vector<2x1x128xf32> to vector<2x128xf32>
    %73 = vector.shape_cast %70 : vector<2x128xf32> to vector<2x1x128xf32>
    tpu.vector_store %arg7[%c0_52, %c0_53, %c0_54], %73 {strides = array<i32>} : memref<2x1x128xf32, #tpu.memory_space<vmem>>, vector<2x1x128xf32>,
    return
  }
}

</mosaic_0001>

<bundles_post_ra>
// kernel: tpu_custom_call.1
= control target key start
LH: loop header
LB: loop body
LE: loop exit
PB: predicated region body
PF: predicated region fallthrough
CT: control target
= control target key end

     0   :  { %12 = vsyncpa [#allocation4], 0  ;;  %s1281_s0 = inlined_call_operand.vmem [shape: f32[32,8], index: 0, kind: input, shape index: {}]   ;;  %s1282_s1 = inlined_call_operand.vmem [shape: f32[4,8,32], index: 1, kind: input, shape index: {}]   ;;  %s1283_s2 = inlined_call_operand.vmem [shape: f32[1,32], index: 2, kind: input, shape index: {}]   ;;  %s1284_s3 = inlined_call_operand.hbm [shape: f32[3,32,32], index: 3, kind: input, shape index: {}]   ;;  %s1285_s4 = inlined_call_operand.vmem [shape: f32[1,32], index: 4, kind: input, shape index: {}]   ;;  %s1286_s5 = inlined_call_operand.hbm [shape: f32[32,128], index: 5, kind: input, shape index: {}]   ;;  %s1287_s6 = inlined_call_operand.vmem [shape: f32[1,128], index: 6, kind: input, shape index: {}]   ;;  %s1288_s7 = inlined_call_operand.hbm [shape: f32[2,1,128], index: 7, kind: output, shape index: {}]  }
   0x1   :  { %13 = vsyncpa [#allocation7], 0 }
   0x2   :  { %14 = vsyncpa [#allocation5], 0  ;;  %s1109_s24 = smov [#allocation3]  }
   0x3   :  { %s26_s25 = sshll.u32 %s1109_s24, 4  ;;  %s27_s25 = int_to_ptr.vmem [resolvable:$true] %s26_s25 }
   0x4   :  { %s1051_s26 = scalar_lea.vmem %s27_s25, 1536  ;;  %p1056_p1 = scmp.lt.s32.totalorder %s27_s25, %s27_s25 }
   0x5   :  { %p1052_p0 = scmp.ne.s32.totalorder %s27_s25, %s1051_s26  ;;  %p1057_p2 = scmp.lt.s32.totalorder %s1051_s26, %s1051_s26 }
   0x7   :  { %p1058_p3 = por %p1057_p2, %p1056_p1 }
   0x9   :  { %p1059_p4 = pnand %p1058_p3, %p1052_p0 }
   0xb   :  { %1062 = shalt.err (!%p1059_p4)
}
   0xc   :  { %s1110_s27 = smov 128   ;;  %s1111_s28 = smov 8  }
   0xd   :  { %32 = dma.hbm_to_vmem [thread:$0]  %s1284_s3, 1536, %s27_s25, [#allocation4], %s1110_s27, %s1110_s27, %s1111_s28  }
   0xe   :  { %s1112_s8 = smov [#allocation6]  }
   0xf   :  { %s40_s9 = sshll.u32 %s1112_s8, 4  ;;  %s41_s9 = int_to_ptr.vmem [resolvable:$true] %s40_s9 }
  0x10   :  { %s1071_s10 = scalar_lea.vmem %s41_s9, 512  ;;  %p1076_p6 = scmp.lt.s32.totalorder %s41_s9, %s41_s9 }
  0x11   :  { %p1072_p5 = scmp.ne.s32.totalorder %s41_s9, %s1071_s10  ;;  %p1077_p7 = scmp.lt.s32.totalorder %s1071_s10, %s1071_s10 }
  0x13   :  { %p1078_p8 = por %p1077_p7, %p1076_p6 }
  0x15   :  { %p1079_p9 = pnand %p1078_p8, %p1072_p5 }
  0x17   :  { %1082 = shalt.err (!%p1079_p9)
}
  0x18   :  { %46 = dma.hbm_to_vmem [thread:$0]  %s1286_s5, 512, %s41_s9, [#allocation7], %s1110_s27, %s1110_s27, %s1111_s28  }
  0x19   :  { %1103 = dma.done.wait [#allocation4], 1536  }
  0x1a   :  { %1104 = vsyncadd [#allocation4], 4294965760 }
  0x1b   :  { %1105 = dma.done.wait [#allocation7], 512  }
  0x1c   :  { %1106 = vsyncadd [#allocation7], 4294966784  ;;  %vm66_vm0 = vcmask 64512   ;;  %v889_v0 = vld [vmem:[%s1282_s1 + $0x8] sm:$0xff]  ;;  %v59_v1 = vld [vmem:[%s1282_s1] sm:$0xff]  ;;  %v1113_v20 = vmov 0.0  }
  0x1d   :  { %v60_v2 = vld [vmem:[%s1281_s0 + $0x2] sm:$0xff]  ;;  %957 = vmatprep.subr.mxu0 %v889_v0  ;;  %965 = vmatprep.subr.mxu1 %v59_v1  ;;  %v61_v4 = vld [vmem:[%s1281_s0 + $0xa] sm:$0xff]  ;;  %v903_v7 = vld [vmem:[%s1282_s1 + $0x18] sm:$0xff]  ;;  %vm1114_vm1 = vmmov 0   ;;  %vm495_vm2 = vcmask 261126   ;;  %vm486_vm3 = vcmask 254976  }
  0x1e   :  { %v55_v3 = vld [vmem:[%s1281_s0] sm:$0xff]  ;;  %v56_v5 = vld [vmem:[%s1281_s0 + $0x8] sm:$0xff]  ;;  %958 = vmatpush3.msra.mxu0 %v889_v0  ;;  %959 = vmatprep.mubr.msk.f32.mxu0 %vm66_vm0, %v60_v2  ;;  %v898_v6 = vld [vmem:[%s1282_s1 + $0x10] sm:$0xff]  ;;  %vm502_vm4 = vcmask 259076   ;;  %vm508_vm5 = vcmask 257026   ;;  %vm521_vm6 = vcmask 261120  }
  0x1f   :  { %966 = vmatpush3.msra.mxu1 %v59_v1  ;;  %967 = vmatprep.mubr.msk.f32.mxu1 %vm66_vm0, %v55_v3  ;;  %v62_v8 = vld [vmem:[%s1281_s0 + $0x12] sm:$0xff]  ;;  %v63_v10 = vld [vmem:[%s1281_s0 + $0x1a] sm:$0x3]  ;;  %v259_v12 = vld [vmem:[%s1281_s0 + $0x4] sm:$0xff] }
  0x20   :  { %960 = vmatmul.mubr.msk.f32.vlgmr.msra.gmra.mxu0 %vm66_vm0, %v61_v4  ;;  %968 = vmatmul.mubr.msk.f32.vlgmr.msra.gmra.mxu1 %vm66_vm0, %v56_v5  ;;  %v57_v9 = vld [vmem:[%s1281_s0 + $0x10] sm:$0xff]  ;;  %v58_v11 = vld [vmem:[%s1281_s0 + $0x18] sm:$0x3]  ;;  %v364_v13 = vld [vmem:[%s1281_s0 + $0x6] sm:$0xff] }
  0x21   :  { %973 = vmatprep.subr.mxu0 %v898_v6  ;;  %981 = vmatprep.subr.mxu1 %v903_v7  ;;  %v260_v14 = vld [vmem:[%s1281_s0 + $0xc] sm:$0xff]  ;;  %v261_v16 = vld [vmem:[%s1281_s0 + $0x14] sm:$0xff]  ;;  %v262_v18 = vld [vmem:[%s1281_s0 + $0x1c] sm:$0x3] }
  0x22   :  { %974 = vmatpush3.msra.mxu0 %v898_v6  ;;  %962 = vmatprep.mubr.msk.f32.mxu0 %vm66_vm0, %v62_v8  ;;  %v365_v15 = vld [vmem:[%s1281_s0 + $0xe] sm:$0xff]  ;;  %v366_v17 = vld [vmem:[%s1281_s0 + $0x16] sm:$0xff]  ;;  %v367_v19 = vld [vmem:[%s1281_s0 + $0x1e] sm:$0x3] }
  0x23   :  { %970 = vmatprep.mubr.msk.f32.mxu1 %vm66_vm0, %v57_v9  ;;  %982 = vmatpush3.msra.mxu1 %v903_v7  ;;  %v514_v21 = vld [vmem:[#allocation3 + $0x18] sm:$0xff]  ;;  %v513_v23 = vld [vmem:[#allocation3 + $0x10] sm:$0xff]  ;;  %v512_v25 = vld [vmem:[#allocation3 + $0x8] sm:$0xff] }
  0x24   :  { %963 = vmatmul.mubr.msk.f32.gmra.mxu0 %vm66_vm0, %v63_v10  ;;  %971 = vmatmul.mubr.msk.f32.gmra.mxu1 %vm66_vm0, %v58_v11  ;;  %v520_v22 = vld [vmem:[#allocation3 + $0x38] sm:$0xff]  ;;  %v519_v24 = vld [vmem:[#allocation3 + $0x30] sm:$0xff]  ;;  %v518_v26 = vld [vmem:[#allocation3 + $0x28] sm:$0xff] }
  0x25   :  { %975 = vmatprep.mubr.msk.f32.mxu0 %vm66_vm0, %v259_v12  ;;  %983 = vmatprep.mubr.msk.f32.mxu1 %vm66_vm0, %v364_v13  ;;  %v511_v27 = vld [vmem:[#allocation3] sm:$0xff]  ;;  %v908_v42 = vld [vmem:[%s1283_s2] ss:$0 sm:$0xff]  ;;  %v672_v11 = vld [vmem:[#allocation3 + $0x50] sm:$0xff] }
  0x26   :  { %1000 = vmatprep.subr.mxu1 %v1113_v20  ;;  %989 = vmatprep.subr.mxu0 %v1113_v20  ;;  %v517_v28 = vld [vmem:[#allocation3 + $0x20] sm:$0xff]  ;;  %v673_v9 = vld [vmem:[#allocation3 + $0x58] sm:$0xff]  ;;  %v671_v12 = vld [vmem:[#allocation3 + $0x48] sm:$0xff] }
  0x27   :  { %v670_v13 = vld [vmem:[#allocation3 + $0x40] sm:$0xff] }
  0x28   :  { %976 = vmatmul.mubr.msk.f32.vlgmr.msra.gmra.mxu0 %vm66_vm0, %v260_v14  ;;  %984 = vmatmul.mubr.msk.f32.vlgmr.msra.gmra.mxu1 %vm66_vm0, %v365_v15  ;;  %v759_v15 = vld [vmem:[#allocation6 + $0x18] sm:$0xff] }
  0x29   :  { %978 = vmatprep.mubr.msk.f32.mxu0 %vm66_vm0, %v261_v16  ;;  %986 = vmatprep.mubr.msk.f32.mxu1 %vm66_vm0, %v366_v17  ;;  %v758_v16 = vld [vmem:[#allocation6 + $0x10] sm:$0xff]  ;;  %v757_v17 = vld [vmem:[#allocation6 + $0x8] sm:$0xff] }
  0x2a   :  { %1001 = vmatpush3.msra.mxu1 %v514_v21  ;;  %990 = vmatpush3.msra.mxu0 %v520_v22 }
  0x2b   :  { %1002 = vmatprep.subr.mxu1 %v1113_v20  ;;  %991 = vmatprep.subr.mxu0 %v1113_v20 }
  0x2c   :  { %979 = vmatmul.mubr.msk.f32.gmra.mxu0 %vm66_vm0, %v262_v18  ;;  %987 = vmatmul.mubr.msk.f32.gmra.mxu1 %vm66_vm0, %v367_v19  ;;  %v756_v18 = vld [vmem:[#allocation6] sm:$0xff] }
  0x2d   :  { %1003 = vmatpush3.msra.mxu1 %v513_v23  ;;  %992 = vmatpush3.msra.mxu0 %v519_v24 }
  0x2e   :  { %1004 = vmatprep.subr.mxu1 %v1113_v20  ;;  %993 = vmatprep.subr.mxu0 %v1113_v20 }
  0x2f   :  { %1005 = vmatpush3.msra.mxu1 %v512_v25  ;;  %994 = vmatpush3.msra.mxu0 %v518_v26  ;;  %v912_v26 = vld [vmem:[%s1285_s4] ss:$0 sm:$0xff]  ;;  %s1116_s4 = smov [#allocation8]  }
  0x30   :  { %1006 = vmatprep.subr.mxu1 %v1113_v20  ;;  %995 = vmatprep.subr.mxu0 %v1113_v20  ;;  %s876_s29 = sshll.u32 %s1116_s4, 4  ;;  %s877_s29 = int_to_ptr.vmem [resolvable:$true] %s876_s29 }
  0x31   :  { %1007 = vmatpush3.msra.mxu1 %v511_v27  ;;  %1008 = vmatprep.mubr.msk.f32.mxu1 %vm1114_vm1, %v1113_v20  ;;  %s1083_s30 = scalar_lea.vmem %s877_s29, 32  ;;  %p1088_p11 = scmp.lt.s32.totalorder %s877_s29, %s877_s29 }
  0x32   :  { %996 = vmatpush3.msra.mxu0 %v517_v28  ;;  %997 = vmatprep.mubr.msk.f32.mxu0 %vm1114_vm1, %v1113_v20  ;;  %p1084_p10 = scmp.ne.s32.totalorder %s877_s29, %s1083_s30  ;;  %p1089_p12 = scmp.lt.s32.totalorder %s1083_s30, %s1083_s30 }
  0x33   :  { %1011 = vmatprep.subr.mxu0 %v1113_v20  ;;  %1022 = vmatprep.subr.mxu1 %v1113_v20 }
  0x34   :  { %p1090_p13 = por %p1089_p12, %p1088_p11 }
  0x36   :  { %p1091_p0 = pnand %p1090_p13, %p1084_p10 }
  0xe0   :  { %v961_v29 = vpop.f32.mrf.mxu0  ;;  %v969_v30 = vpop.f32.mrf.mxu1 }
  0xe1   :  { %v247_v37 = vadd.f32 %v969_v30, %v961_v29 }
  0xe2   :  { %v145_v31 = vpop.f32.mrf.mxu0  ;;  %v241_v32 = vpop.f32.mrf.mxu1 }
  0xe3   :  { %v242_v40 = vadd.f32 %v241_v32, %v145_v31 }
  0xe4   :  { %v964_v33 = vpop.f32.mrf.mxu0  ;;  %v972_v34 = vpop.f32.mrf.mxu1 }
  0xe5   :  { %v848_v33 = vlaneseq }
  0xe6   :  { %v155_v35 = vpop.f32.mrf.mxu0  ;;  %v251_v36 = vpop.f32.mrf.mxu1 }
  0xe7   :  { %v252_v49 = vadd.f32 %v251_v36, %v155_v35  ;;  %v849_v35 = vshrl.u32 %v848_v33, 7  ;;  %v913_v36 = vld [vmem:[%s1287_s6] ss:$0 sm:$0xff] }
  0xe8   :  { %v977_v38 = vpop.f32.mrf.mxu0  ;;  %v985_v39 = vpop.f32.mrf.mxu1 }
  0xe9   :  { %v362_v41 = vadd.f32 %v977_v38, %v247_v37 }
  0xea   :  { %v343_v43 = vpop.f32.mrf.mxu0  ;;  %v448_v44 = vpop.f32.mrf.mxu1 }
  0xeb   :  { %v467_v45 = vadd.f32 %v985_v39, %v362_v41  ;;  %v361_v46 = vadd.f32 %v343_v43, %v242_v40 }
  0xec   :  { %v980_v47 = vpop.f32.mrf.mxu0  ;;  %v988_v48 = vpop.f32.mrf.mxu1 }
  0xed   :  { %v477_v50 = vadd.f32 %v908_v42, %v467_v45  ;;  %v466_v51 = vadd.f32 %v448_v44, %v361_v46 }
  0xee   :  { %v353_v52 = vpop.f32.mrf.mxu0  ;;  %v458_v59 = vpop.f32.mrf.mxu1 }
  0xef   :  { %v489_v53 = vrot.slane %v477_v50, 2  ;;  %v476_v54 = vadd.f32 %v908_v42, %v466_v51  ;;  %v363_v55 = vadd.f32 %v353_v52, %v252_v49  ;;  %v492_v56 = vrot.slane %v477_v50, 4 }
  0xf1   :  { %v480_v57 = vrot.slane %v476_v54, 2  ;;  %v491_v58 = vmax.f32 %v476_v54, %v489_v53  ;;  %v468_v60 = vadd.f32 %v458_v59, %v363_v55  ;;  %v483_v62 = vrot.slane %v476_v54, 4 }
  0xf2   :  { %v497_v2 = vmax.f32 %v477_v50, %v489_v53 }
  0xf3   :  { %v482_v61 = vmax.f32 %v476_v54, %v480_v57  ;;  %v494_v63 = vmax.f32 %v491_v58, %v492_v56  ;;  %v478_v0 = vadd.f32 %v908_v42, %v468_v60 }
  0xf5   :  { %v485_v1 = vmax.f32 %v482_v61, %v483_v62  ;;  %496 = vst.msk [vmem:[#allocation2 - $0x4] sm:$0xc0] %vm495_vm2, %v494_v63  ;;  %v499_v3 = vrot.slane %v478_v0, 4  ;;  %v504_v4 = vrot.slane %v478_v0, 2 }
  0xf7   :  { %487 = vst.msk [vmem:[#allocation2] sm:$0x3] %vm486_vm3, %v485_v1  ;;  %v501_v5 = vmax.f32 %v497_v2, %v499_v3  ;;  %v506_v6 = vmax.f32 %v478_v0, %v504_v4 }
  0xf9   :  { %503 = vst.msk [vmem:[#allocation2] sm:$0x30] %vm502_vm4, %v501_v5  ;;  %v507_v7 = vmax.f32 %v506_v6, %v499_v3 }
  0xfb   :  { %509 = vst.msk [vmem:[#allocation2 + $0x4] sm:$0xc] %vm508_vm5, %v507_v7 }
  0xfe   :  { %v510_v8 = vld [vmem:[#allocation2] sm:$0xf] }
  0xff   :  { %1009 = vmatmul.mubr.msk.f32.vlgmr.msra.gmra.mxu1 %vm521_vm6, %v510_v8 }
 0x100   :  { %1030 = vmatprep.mubr.msk.f32.mxu1 %vm1114_vm1, %v1113_v20  ;;  %v515_v10 = vld [vmem:[#allocation2 + $0x2] sm:$0xf]  ;;  %1023 = vmatpush3.msra.mxu1 %v759_v15 }
 0x101   :  { %998 = vmatmul.mubr.msk.f32.vlgmr.msra.gmra.mxu0 %vm521_vm6, %v515_v10  ;;  %1024 = vmatprep.subr.mxu1 %v1113_v20 }
 0x102   :  { %1012 = vmatpush3.msra.mxu0 %v673_v9  ;;  %1019 = vmatprep.mubr.msk.f32.mxu0 %vm1114_vm1, %v1113_v20  ;;  %v668_v14 = vld [vmem:[#allocation2 + $0x4] sm:$0xf] }
 0x103   :  { %1013 = vmatprep.subr.mxu0 %v1113_v20  ;;  %1025 = vmatpush3.msra.mxu1 %v758_v16 }
 0x104   :  { %1014 = vmatpush3.msra.mxu0 %v672_v11  ;;  %1026 = vmatprep.subr.mxu1 %v1113_v20 }
 0x105   :  { %1015 = vmatprep.subr.mxu0 %v1113_v20  ;;  %1027 = vmatpush3.msra.mxu1 %v757_v17 }
 0x106   :  { %1016 = vmatpush3.msra.mxu0 %v671_v12  ;;  %1028 = vmatprep.subr.mxu1 %v1113_v20 }
 0x107   :  { %1017 = vmatprep.subr.mxu0 %v1113_v20  ;;  %1029 = vmatpush3.msra.mxu1 %v756_v18  ;;  %v1115_v20 = vmov 1966171168  }
 0x108   :  { %1018 = vmatpush3.msra.mxu0 %v670_v13  ;;  %v846_v32 = vunpack.c.l.s4 %v1115_v20 }
 0x109   :  { %1020 = vmatmul.mubr.msk.f32.vlgmr.msra.gmra.mxu0 %vm521_vm6, %v668_v14 }
 0x10a   :  { %v847_v34 = vunpack.c.0.s8 %v846_v32 }
 0x10c   :  { %v850_v37 = vsub.s32 %v847_v34, %v849_v35 }
 0x1bf   :  { %v664_v19 = vpop.f32.mrf.mxu1 }
 0x1c1   :  { %v1010_v21 = vpop.f32.mrf.mxu1  ;;  %v591_v22 = vpop.f32.mrf.mxu0 }
 0x1c2   :  { %v665_v24 = vadd.f32 %v664_v19, %v591_v22 }
 0x1c3   :  { %v999_v23 = vpop.f32.mrf.mxu0 }
 0x1c9   :  { %v743_v25 = vpop.f32.mrf.mxu0 }
 0x1ca   :  { %v747_v27 = vadd.f32 %v743_v25, %v665_v24 }
 0x1cb   :  { %v1021_v28 = vpop.f32.mrf.mxu0 }
 0x1cc   :  { %v755_v29 = vadd.f32 %v912_v26, %v747_v27 }
 0x1ce   :  { %v762_v30 = vrot.slane %v755_v29, 2 }
 0x1d0   :  { %v764_v31 = vmax.f32 %v755_v29, %v762_v30 }
 0x1d2   :  { %1031 = vmatmul.mubr.msk.f32.vlgmr.msra.gmra.mxu1 %vm521_vm6, %v764_v31 }
 0x292   :  { %v840_v38 = vpop.f32.mrf.mxu1 }
 0x293   :  { %v841_v39 = vadd.f32 %v913_v36, %v840_v38 }
 0x294   :  { %v1032_v40 = vpop.f32.mrf.mxu1 }
 0x295   :  { %v851_v41 = vrot.slane %v841_v39, %v850_v37 }
 0x297   :  { %v852_v42 = vcombine.high %v851_v41, %v851_v41  ;;  %915 = vst.sshfl [vmem:[#allocation8] sm:$0x1 pattern:$0x73625140] %v851_v41 }
 0x299   :  { %916 = vst.sshfl [vmem:[#allocation8 + $0x1] sm:$0x1 pattern:$0x73625140] %v852_v42 }
 0x29a   :  { %1094 = shalt.err (!%p1091_p0)
}
 0x29b   :  { %s1117_s8 = smov 16   ;;  %s1118_s6 = smov 1  }
 0x29c   :  { %882 = dma.vmem_to_hbm [thread:$0]  %s877_s29, 32, %s1288_s7, [#allocation5], %s1117_s8, %s1117_s8, %s1118_s6  }
 0x29d   :  { %1107 = dma.done.wait [#allocation5], 32  }
 0x29e   :  { %1108 = vsyncadd [#allocation5], 4294967264 }
 0x29f   :  { %886 = vsyncpa [#allocation4], 1 }
 0x2a0   :  { %887 = vsyncpa [#allocation7], 1 }
 0x2a1   :  { %888 = vsyncpa [#allocation5], 1 }

</bundles_post_ra>
